<compile_context>
chip_gen: v5e
topology: v5e:2x2
jax: 0.10.0
libtpu: 0.0.40
codegen_flags: <defaults>
</compile_context>

<pallas_src>
import numpy as np
import jax
import jax.numpy as jnp
from jax import lax
from jax.experimental import pallas as pl
from jax.experimental.pallas import tpu as pltpu


# --------------------------------------------------------------------------
# Constant setup (numpy / plain JAX, input independent)
# --------------------------------------------------------------------------

def _center_kernel2d(kh, kw):
    """Mirror of _get_center_kernel2d (numpy, constant setup)."""
    ck = np.zeros((2, 2, kh, kw), np.float32)
    if kh % 2 != 0:
        h1, h2 = kh // 2, kh // 2 + 1
    else:
        h1, h2 = kh // 2 - 1, kh // 2 + 1
    if kw % 2 != 0:
        w1, w2 = kw // 2, kw // 2 + 1
    else:
        w1, w2 = kw // 2 - 1, kw // 2 + 1
    val = 1.0 / float((h2 - h1) * (w2 - w1))
    ck[0, 0, h1:h2, w1:w2] = val
    ck[1, 1, h1:h2, w1:w2] = val
    return jnp.asarray(ck)


def _window_weights_1d(k, eps):
    """Separable window residual weights (mirror of _get_window_grid_kernel2d:
    x-weight depends only on the column index, y-weight only on the row)."""
    denom = max(k - 1, eps)
    return [2.0 * i / denom - 1.0 for i in range(k)]


def _grid_global_pooled(h, w, kh, kw, sh, sw, ph, pw):
    """conv2d(create_meshgrid(h, w), center_kernel) -> (2, H_out, W_out).
    Pure constant setup (input independent), computed in plain JAX/f32."""
    ys, xs = jnp.meshgrid(jnp.arange(h, dtype=jnp.float32),
                          jnp.arange(w, dtype=jnp.float32), indexing="ij")
    grid_global = jnp.stack([xs, ys])[None]          # (1, 2, h, w): ch0=x, ch1=y
    ck = _center_kernel2d(kh, kw)                    # (2, 2, kh, kw)
    pooled = lax.conv_general_dilated(
        grid_global, ck, window_strides=(sh, sw),
        padding=[(ph, ph), (pw, pw)],
        dimension_numbers=("NCHW", "OIHW", "NCHW"))
    return pooled[0]                                 # (2, H_out, W_out) f32


# --------------------------------------------------------------------------
# VMEM budgeting (accounts for (8, 128) vreg-tiling padding)
# --------------------------------------------------------------------------

def _round_up(v, m):
    return -(-v // m) * m


def _padded_tile_bytes(rows, cols, dtype_bytes=4):
    """VMEM footprint of a (rows, cols) f32 tile after (8, 128) tiling."""
    return dtype_bytes * _round_up(max(rows, 1), 8) * _round_up(max(cols, 1), 128)


def _bytes_per_map(H, W, Hp, Wp, H_out, W_out, output_value):
    """Per-map VMEM working set for one grid step (incl. double buffering)."""
    b = 0
    b += 2 * _padded_tile_bytes(H, W)                  # input block (dbl-buffered)
    b += 2 * 2 * _padded_tile_bytes(H_out, W_out)      # coords out (2 planes, dbl)
    b += _padded_tile_bytes(Hp, Wp)                    # padded exp scratch
    b += 2 * _padded_tile_bytes(Hp, W_out)             # rsum + rwx scratch
    if output_value:
        b += _padded_tile_bytes(Hp, Wp)                # padded exp*x scratch
        b += _padded_tile_bytes(Hp, W_out)             # rval scratch
        b += 2 * _padded_tile_bytes(H_out, W_out)      # value out (dbl-buffered)
    return b


def _choose_block_n(n, bytes_per_map, budget=24 << 20):
    """Maps per grid step: amortize ~0.35us/step overhead with big blocks,
    but keep >= 2 steps so both v7x TensorCores get work and prefer >= 4
    steps (if blocks stay >= 2 MiB) for better pipeline overlap."""
    tn = max(1, min(n, budget // max(bytes_per_map, 1), 1024))
    if n > 1:
        tn = min(tn, -(-n // 2))
    tn4 = -(-n // 4)
    if n >= 4 and tn4 * bytes_per_map >= (2 << 20):
        tn = min(tn, tn4)
    return int(max(tn, 1))


# --------------------------------------------------------------------------
# Pallas kernel + wrapper
# --------------------------------------------------------------------------

def conv_soft_argmax2d(x, kernel_size=(3, 3), stride=(1, 1), padding=(1, 1),
                       temperature=1.0, normalized_coordinates=True,
                       eps=1e-8, output_value=False):
    if x.ndim != 4:
        raise ValueError("Invalid input shape, we expect BxCxHxW. Got: {}".format(x.shape))
    if temperature <= 0:
        raise ValueError("Temperature should be positive. Got: {}".format(temperature))
    B, C, H, W = x.shape
    kh, kw = kernel_size
    sh, sw = stride
    ph, pw = padding
    if (sh, sw) != (1, 1):
        # TODO(synk): general stride needs strided window reads (pl.ds(..., stride=s)).
        raise NotImplementedError("Only stride=(1, 1) is supported in the Pallas kernel.")

    H_out = (H + 2 * ph - kh) // sh + 1
    W_out = (W + 2 * pw - kw) // sw + 1
    Hp, Wp = H + 2 * ph, W + 2 * pw

    # Separable window weights; fold the [-1, 1] normalization constants into
    # the weights and the pooled center grid so the kernel epilogue is 1 FMA.
    wx = _window_weights_1d(kw, eps)     # depends only on window column
    wy = _window_weights_1d(kh, eps)     # depends only on window row
    gg = _grid_global_pooled(H, W, kh, kw, sh, sw, ph, pw)   # (2, H_out, W_out) f32
    if normalized_coordinates:
        sx = 2.0 / max(W - 1, eps)
        sy = 2.0 / max(H - 1, eps)
        wx = [sx * v for v in wx]
        wy = [sy * v for v in wy]
        gg = jnp.stack([sx * gg[0] - 1.0, sy * gg[1] - 1.0])
    gg = gg.astype(jnp.float32)          # keep in f32 regardless of x.dtype

    N = B * C
    xf = x.reshape(N, H, W)

    # TODO(synk): a single map whose working set exceeds VMEM (huge H*W) would
    # need spatial tiling with halos; not needed for typical heatmap sizes.
    bytes_per_map = _bytes_per_map(H, W, Hp, Wp, H_out, W_out, output_value)
    TN = _choose_block_n(N, bytes_per_map)
    nb = -(-N // TN)
    n_pad = nb * TN
    if n_pad != N:
        xf = jnp.concatenate([xf, jnp.zeros((n_pad - N, H, W), xf.dtype)], axis=0)

    inv_temp = 1.0 / float(temperature)
    eps_f = float(eps)

    def kernel(x_ref, gg_ref, *refs):
        if output_value:
            (out_ref, val_ref, pad_ref, padv_ref,
             rsum_ref, rwx_ref, rval_ref) = refs
        else:
            out_ref, pad_ref, rsum_ref, rwx_ref = refs
            val_ref = padv_ref = rval_ref = None

        # Keep the zero border of the padded scratch valid.  Only the thin pad
        # strips are stored (interior is fully overwritten below); doing it
        # every step keeps the kernel correct when the "parallel" grid axis is
        # split across TensorCores (each core has its own scratch).
        if ph > 0:
            zrow = jnp.zeros((TN, ph, Wp), jnp.float32)
            pad_ref[:, pl.ds(0, ph), :] = zrow
            pad_ref[:, pl.ds(ph + H, ph), :] = zrow
            if output_value:
                padv_ref[:, pl.ds(0, ph), :] = zrow
                padv_ref[:, pl.ds(ph + H, ph), :] = zrow
        if pw > 0:
            zcol = jnp.zeros((TN, Hp, pw), jnp.float32)
            pad_ref[:, :, pl.ds(0, pw)] = zcol
            pad_ref[:, :, pl.ds(pw + W, pw)] = zcol
            if output_value:
                padv_ref[:, :, pl.ds(0, pw)] = zcol
                padv_ref[:, :, pl.ds(pw + W, pw)] = zcol

        xs = x_ref[...].astype(jnp.float32)                      # (TN, H, W)
        # per-map softmax max (must stay per-map, not block-wide)
        x_max = jnp.max(jnp.max(xs, axis=2, keepdims=True), axis=1, keepdims=True)
        x_exp = jnp.exp((xs - x_max) * inv_temp)                 # EUP
        pad_ref[:, pl.ds(ph, H), pl.ds(pw, W)] = x_exp
        if output_value:
            padv_ref[:, pl.ds(ph, H), pl.ds(pw, W)] = x_exp * xs

        # --- separable window accumulation -------------------------------
        # Width (lane) pass: plain row sum + wx-weighted row sum (+ value sum).
        rowsum = pad_ref[:, :, pl.ds(0, W_out)]                  # (TN, Hp, W_out)
        roww = wx[0] * rowsum if wx[0] != 0.0 else None
        rowv = padv_ref[:, :, pl.ds(0, W_out)] if output_value else None
        for dj in range(1, kw):
            win = pad_ref[:, :, pl.ds(dj, W_out)]
            rowsum = rowsum + win
            if wx[dj] != 0.0:                # center weight is exactly 0: skip
                t = wx[dj] * win
                roww = t if roww is None else roww + t
            if output_value:
                rowv = rowv + padv_ref[:, :, pl.ds(dj, W_out)]
        if roww is None:
            roww = jnp.zeros_like(rowsum)
        rsum_ref[...] = rowsum
        rwx_ref[...] = roww
        if output_value:
            rval_ref[...] = rowv

        # Height (sublane) pass: den, num_x, wy-weighted num_y (+ num_v).
        first = rsum_ref[:, pl.ds(0, H_out), :]                  # (TN, H_out, W_out)
        den = first
        num_x = rwx_ref[:, pl.ds(0, H_out), :]
        num_y = wy[0] * first if wy[0] != 0.0 else None
        num_v = rval_ref[:, pl.ds(0, H_out), :] if output_value else None
        for di in range(1, kh):
            rs = rsum_ref[:, pl.ds(di, H_out), :]
            den = den + rs
            num_x = num_x + rwx_ref[:, pl.ds(di, H_out), :]
            if wy[di] != 0.0:
                t = wy[di] * rs
                num_y = t if num_y is None else num_y + t
            if output_value:
                num_v = num_v + rval_ref[:, pl.ds(di, H_out), :]
        if num_y is None:
            num_y = jnp.zeros_like(den)

        d = den + eps_f
        inv = pl.reciprocal(d, approx=True)      # EUP slot (VALU stays free)
        inv = inv * (2.0 - d * inv)              # one Newton step -> f32 accurate

        # Constants already folded: cx = num_x/den + (scale*gg_x - 1), etc.
        cx = num_x * inv + gg_ref[0]
        cy = num_y * inv + gg_ref[1]
        out_ref[:, 0, :, :] = cx.astype(out_ref.dtype)
        out_ref[:, 1, :, :] = cy.astype(out_ref.dtype)
        if output_value:
            val_ref[...] = (num_v * inv).astype(val_ref.dtype)

    gg_bytes = 2 * 2 * _padded_tile_bytes(H_out, W_out)
    vmem_need = TN * bytes_per_map + gg_bytes + (4 << 20)
    vmem_limit = int(min(max(vmem_need, 32 << 20), 48 << 20))

    in_specs = [pl.BlockSpec((TN, H, W), lambda n: (n, 0, 0)),
                pl.BlockSpec((2, H_out, W_out), lambda n: (0, 0, 0))]

    if output_value:
        out_shape = (jax.ShapeDtypeStruct((n_pad, 2, H_out, W_out), x.dtype),
                     jax.ShapeDtypeStruct((n_pad, H_out, W_out), x.dtype))
        out_specs = (pl.BlockSpec((TN, 2, H_out, W_out), lambda n: (n, 0, 0, 0)),
                     pl.BlockSpec((TN, H_out, W_out), lambda n: (n, 0, 0)))
        scratch_shapes = [pltpu.VMEM((TN, Hp, Wp), jnp.float32),      # pad (exp)
                          pltpu.VMEM((TN, Hp, Wp), jnp.float32),      # padv (exp*x)
                          pltpu.VMEM((TN, Hp, W_out), jnp.float32),   # rsum
                          pltpu.VMEM((TN, Hp, W_out), jnp.float32),   # rwx
                          pltpu.VMEM((TN, Hp, W_out), jnp.float32)]   # rval
    else:
        out_shape = jax.ShapeDtypeStruct((n_pad, 2, H_out, W_out), x.dtype)
        out_specs = pl.BlockSpec((TN, 2, H_out, W_out), lambda n: (n, 0, 0, 0))
        scratch_shapes = [pltpu.VMEM((TN, Hp, Wp), jnp.float32),      # pad (exp)
                          pltpu.VMEM((TN, Hp, W_out), jnp.float32),   # rsum
                          pltpu.VMEM((TN, Hp, W_out), jnp.float32)]   # rwx

    result = pl.pallas_call(
        kernel,
        out_shape=out_shape,
        grid_spec=pltpu.PrefetchScalarGridSpec(
            num_scalar_prefetch=0,
            grid=(nb,),
            in_specs=in_specs,
            out_specs=out_specs,
            scratch_shapes=scratch_shapes),
        compiler_params=pltpu.CompilerParams(
            dimension_semantics=("parallel",),
            vmem_limit_bytes=vmem_limit),
    )(xf, gg)

    # Trailing reshapes are contiguous row-major reshapes -> free (metadata only).
    # TODO(synk): for W_out < 128 a lane-dense repack (packing maps along the
    # lane dim) would further raise vreg/store utilization, at the cost of an
    # in-kernel relayout; left out to keep the kernel simple and robust.
    if output_value:
        coords_flat, vals_flat = result
        coords = coords_flat[:N].reshape(B, C, 2, H_out, W_out)
        vals = vals_flat[:N].reshape(B, C, H_out, W_out)
        return coords, vals
    coords = result[:N].reshape(B, C, 2, H_out, W_out)
    return coords


class ConvSoftArgmax2d:
    """JAX/Pallas equivalent of the PyTorch ConvSoftArgmax2d module."""

    def __init__(self, kernel_size=(3, 3), stride=(1, 1), padding=(1, 1),
                 temperature=1.0, normalized_coordinates=True, eps=1e-8,
                 output_value=False):
        self.kernel_size = kernel_size
        self.stride = stride
        self.padding = padding
        self.temperature = float(temperature)
        self.normalized_coordinates = normalized_coordinates
        self.eps = eps
        self.output_value = output_value

    def __call__(self, x):
        return conv_soft_argmax2d(x, self.kernel_size, self.stride, self.padding,
                                  self.temperature, self.normalized_coordinates,
                                  self.eps, self.output_value)


# --------------------------------------------------------------------------
# Pure-JAX reference (mirrors the PyTorch code) for correctness checking
# --------------------------------------------------------------------------

def _conv_soft_argmax2d_ref(x, kernel_size=(3, 3), stride=(1, 1), padding=(1, 1),
                            temperature=1.0, eps=1e-8, output_value=False):
    B, C, H, W = x.shape
    kh, kw = kernel_size
    sh, sw = stride
    ph, pw = padding
    xf = x.reshape(B * C, 1, H, W).astype(jnp.float32)
    x_max = jnp.max(xf, axis=(2, 3), keepdims=True)
    x_exp = jnp.exp((xf - x_max) / temperature)

    wx = _window_weights_1d(kw, eps)
    wy = _window_weights_1d(kh, eps)
    wk = np.zeros((2, 1, kh, kw), np.float32)
    for di in range(kh):
        for dj in range(kw):
            wk[0, 0, di, dj] = wx[dj]
            wk[1, 0, di, dj] = wy[di]
    wk = jnp.asarray(wk)
    ones_k = jnp.ones((1, 1, kh, kw), jnp.float32)

    def conv(a, k):
        return lax.conv_general_dilated(a, k, (sh, sw), [(ph, ph), (pw, pw)],
                                        dimension_numbers=("NCHW", "OIHW", "NCHW"))

    den = conv(x_exp, ones_k) + eps
    num = conv(x_exp, wk)
    gg = _grid_global_pooled(H, W, kh, kw, sh, sw, ph, pw)
    coords = num / den + gg[None]
    cx = (2.0 / max(W - 1, eps)) * coords[:, 0] - 1.0
    cy = (2.0 / max(H - 1, eps)) * coords[:, 1] - 1.0
    coords = jnp.stack([cx, cy], axis=1)
    H_out, W_out = coords.shape[2], coords.shape[3]
    coords = coords.reshape(B, C, 2, H_out, W_out).astype(x.dtype)
    if output_value:
        vals = conv(x_exp * xf, ones_k) / den
        vals = vals.reshape(B, C, H_out, W_out).astype(x.dtype)
        return coords, vals
    return coords


if __name__ == "__main__":
    key = jax.random.PRNGKey(0)
    x = jax.random.normal(key, (2, 4, 16, 16), dtype=jnp.float32)

    # Default path: coords only (output_value=False).
    module = ConvSoftArgmax2d()
    out = jax.block_until_ready(module(x))
    assert out.shape == (2, 4, 2, 16, 16), out.shape
    ref = _conv_soft_argmax2d_ref(x)
    np.testing.assert_allclose(np.asarray(out), np.asarray(ref), atol=1e-5, rtol=1e-5)

    # output_value=True path: coords + softmax-pooled heatmap values.
    module_v = ConvSoftArgmax2d(output_value=True)
    coords, vals = module_v(x)
    coords = jax.block_until_ready(coords)
    vals = jax.block_until_ready(vals)
    assert coords.shape == (2, 4, 2, 16, 16), coords.shape
    assert vals.shape == (2, 4, 16, 16), vals.shape
    ref_c, ref_v = _conv_soft_argmax2d_ref(x, output_value=True)
    np.testing.assert_allclose(np.asarray(coords), np.asarray(ref_c), atol=1e-5, rtol=1e-5)
    np.testing.assert_allclose(np.asarray(vals), np.asarray(ref_v), atol=1e-5, rtol=1e-5)

    print("KERNEL_OK")
</pallas_src>

<mosaic_0001>
module attributes {stable_mosaic.version = 11 : i64} {
  func.func @kernel(%arg0: i32, %arg1: memref<4x16x16xf32, #tpu.memory_space<vmem>>, %arg2: memref<2x16x16xf32, #tpu.memory_space<vmem>>, %arg3: memref<4x2x16x16xf32, #tpu.memory_space<vmem>>, %arg4: memref<4x18x18xf32, #tpu.memory_space<vmem>>, %arg5: memref<4x18x16xf32, #tpu.memory_space<vmem>>, %arg6: memref<4x18x16xf32, #tpu.memory_space<vmem>>) attributes {dimension_semantics = [#tpu.dimension_semantics<parallel>], iteration_bounds = array<i64: 2>, scalar_prefetch = 0 : i64, scratch_operands = 3 : i64, tpu.core_type = #tpu.core_type<tc>, window_params = [{transform_indices = @transform_0, window_bounds = array<i64: 4, 16, 16>}, {pipeline_mode = #tpu.pipeline_mode<synchronous>, transform_indices = @transform_1, window_bounds = array<i64: 2, 16, 16>}, {transform_indices = @transform_2, window_bounds = array<i64: 4, 2, 16, 16>}]} {
    %cst = arith.constant 0.000000e+00 : f32
    %0 = vector.broadcast %cst : f32 to vector<4x1x18xf32>
    %c0 = arith.constant 0 : index
    %c0_0 = arith.constant 0 : index
    %c0_1 = arith.constant 0 : index
    %1 = vector.load %arg4[%c0, %c0_0, %c0_1] : memref<4x18x18xf32, #tpu.memory_space<vmem>>, vector<4x1x18xf32>
    tpu.vector_store %arg4[%c0, %c0_0, %c0_1], %0 {strides = array<i32>} : memref<4x18x18xf32, #tpu.memory_space<vmem>>, vector<4x1x18xf32>,
    %c0_2 = arith.constant 0 : index
    %c17 = arith.constant 17 : index
    %c0_3 = arith.constant 0 : index
    %2 = vector.load %arg4[%c0_2, %c17, %c0_3] : memref<4x18x18xf32, #tpu.memory_space<vmem>>, vector<4x1x18xf32>
    tpu.vector_store %arg4[%c0_2, %c17, %c0_3], %0 {strides = array<i32>} : memref<4x18x18xf32, #tpu.memory_space<vmem>>, vector<4x1x18xf32>,
    %cst_4 = arith.constant 0.000000e+00 : f32
    %3 = vector.broadcast %cst_4 : f32 to vector<4x18x1xf32>
    %c0_5 = arith.constant 0 : index
    %c0_6 = arith.constant 0 : index
    %c0_7 = arith.constant 0 : index
    %4 = vector.load %arg4[%c0_5, %c0_6, %c0_7] : memref<4x18x18xf32, #tpu.memory_space<vmem>>, vector<4x18x1xf32>
    tpu.vector_store %arg4[%c0_5, %c0_6, %c0_7], %3 {strides = array<i32>} : memref<4x18x18xf32, #tpu.memory_space<vmem>>, vector<4x18x1xf32>,
    %c0_8 = arith.constant 0 : index
    %c0_9 = arith.constant 0 : index
    %c17_10 = arith.constant 17 : index
    %5 = vector.load %arg4[%c0_8, %c0_9, %c17_10] : memref<4x18x18xf32, #tpu.memory_space<vmem>>, vector<4x18x1xf32>
    tpu.vector_store %arg4[%c0_8, %c0_9, %c17_10], %3 {strides = array<i32>} : memref<4x18x18xf32, #tpu.memory_space<vmem>>, vector<4x18x1xf32>,
    %c0_11 = arith.constant 0 : index
    %c0_12 = arith.constant 0 : index
    %c0_13 = arith.constant 0 : index
    %6 = vector.load %arg1[%c0_11, %c0_12, %c0_13] : memref<4x16x16xf32, #tpu.memory_space<vmem>>, vector<4x16x16xf32>
    %cst_14 = arith.constant dense<0xFF800000> : vector<4x16xf32>
    %7 = vector.multi_reduction <maximumf>, %6, %cst_14 [2] : vector<4x16x16xf32> to vector<4x16xf32>
    %8 = vector.shape_cast %7 : vector<4x16xf32> to vector<4x16x1xf32>
    %cst_15 = arith.constant dense<0xFF800000> : vector<4x1xf32>
    %9 = vector.multi_reduction <maximumf>, %8, %cst_15 [1] : vector<4x16x1xf32> to vector<4x1xf32>
    %10 = vector.shape_cast %9 : vector<4x1xf32> to vector<4x1x1xf32>
    %11 = vector.broadcast %10 : vector<4x1x1xf32> to vector<4x16x16xf32>
    %12 = arith.subf %6, %11 : vector<4x16x16xf32>
    %cst_16 = arith.constant 1.000000e+00 : f32
    %13 = vector.broadcast %cst_16 : f32 to vector<4x16x16xf32>
    %14 = arith.mulf %12, %13 : vector<4x16x16xf32>
    %15 = math.exp %14 : vector<4x16x16xf32>
    %c0_17 = arith.constant 0 : index
    %c1 = arith.constant 1 : index
    %c1_18 = arith.constant 1 : index
    %16 = vector.load %arg4[%c0_17, %c1, %c1_18] : memref<4x18x18xf32, #tpu.memory_space<vmem>>, vector<4x16x16xf32>
    tpu.vector_store %arg4[%c0_17, %c1, %c1_18], %15 {strides = array<i32>} : memref<4x18x18xf32, #tpu.memory_space<vmem>>, vector<4x16x16xf32>,
    %c0_19 = arith.constant 0 : index
    %c0_20 = arith.constant 0 : index
    %c0_21 = arith.constant 0 : index
    %17 = vector.load %arg4[%c0_19, %c0_20, %c0_21] : memref<4x18x18xf32, #tpu.memory_space<vmem>>, vector<4x18x16xf32>
    %cst_22 = arith.constant -0.13333334 : f32
    %18 = vector.broadcast %cst_22 : f32 to vector<4x18x16xf32>
    %19 = arith.mulf %18, %17 : vector<4x18x16xf32>
    %c0_23 = arith.constant 0 : index
    %c0_24 = arith.constant 0 : index
    %c1_25 = arith.constant 1 : index
    %20 = vector.load %arg4[%c0_23, %c0_24, %c1_25] : memref<4x18x18xf32, #tpu.memory_space<vmem>>, vector<4x18x16xf32>
    %21 = arith.addf %17, %20 : vector<4x18x16xf32>
    %c0_26 = arith.constant 0 : index
    %c0_27 = arith.constant 0 : index
    %c2 = arith.constant 2 : index
    %22 = vector.load %arg4[%c0_26, %c0_27, %c2] : memref<4x18x18xf32, #tpu.memory_space<vmem>>, vector<4x18x16xf32>
    %23 = arith.addf %21, %22 : vector<4x18x16xf32>
    %cst_28 = arith.constant 0.13333334 : f32
    %24 = vector.broadcast %cst_28 : f32 to vector<4x18x16xf32>
    %25 = arith.mulf %24, %22 : vector<4x18x16xf32>
    %26 = arith.addf %19, %25 : vector<4x18x16xf32>
    %c0_29 = arith.constant 0 : index
    %c0_30 = arith.constant 0 : index
    %c0_31 = arith.constant 0 : index
    %27 = vector.load %arg5[%c0_29, %c0_30, %c0_31] : memref<4x18x16xf32, #tpu.memory_space<vmem>>, vector<4x18x16xf32>
    tpu.vector_store %arg5[%c0_29, %c0_30, %c0_31], %23 {strides = array<i32>} : memref<4x18x16xf32, #tpu.memory_space<vmem>>, vector<4x18x16xf32>,
    %c0_32 = arith.constant 0 : index
    %c0_33 = arith.constant 0 : index
    %c0_34 = arith.constant 0 : index
    %28 = vector.load %arg6[%c0_32, %c0_33, %c0_34] : memref<4x18x16xf32, #tpu.memory_space<vmem>>, vector<4x18x16xf32>
    tpu.vector_store %arg6[%c0_32, %c0_33, %c0_34], %26 {strides = array<i32>} : memref<4x18x16xf32, #tpu.memory_space<vmem>>, vector<4x18x16xf32>,
    %c0_35 = arith.constant 0 : index
    %c0_36 = arith.constant 0 : index
    %c0_37 = arith.constant 0 : index
    %29 = vector.load %arg5[%c0_35, %c0_36, %c0_37] : memref<4x18x16xf32, #tpu.memory_space<vmem>>, vector<4x16x16xf32>
    %c0_38 = arith.constant 0 : index
    %c0_39 = arith.constant 0 : index
    %c0_40 = arith.constant 0 : index
    %30 = vector.load %arg6[%c0_38, %c0_39, %c0_40] : memref<4x18x16xf32, #tpu.memory_space<vmem>>, vector<4x16x16xf32>
    %cst_41 = arith.constant -0.13333334 : f32
    %31 = vector.broadcast %cst_41 : f32 to vector<4x16x16xf32>
    %32 = arith.mulf %31, %29 : vector<4x16x16xf32>
    %c0_42 = arith.constant 0 : index
    %c1_43 = arith.constant 1 : index
    %c0_44 = arith.constant 0 : index
    %33 = vector.load %arg5[%c0_42, %c1_43, %c0_44] : memref<4x18x16xf32, #tpu.memory_space<vmem>>, vector<4x16x16xf32>
    %34 = arith.addf %29, %33 : vector<4x16x16xf32>
    %c0_45 = arith.constant 0 : index
    %c1_46 = arith.constant 1 : index
    %c0_47 = arith.constant 0 : index
    %35 = vector.load %arg6[%c0_45, %c1_46, %c0_47] : memref<4x18x16xf32, #tpu.memory_space<vmem>>, vector<4x16x16xf32>
    %36 = arith.addf %30, %35 : vector<4x16x16xf32>
    %c0_48 = arith.constant 0 : index
    %c2_49 = arith.constant 2 : index
    %c0_50 = arith.constant 0 : index
    %37 = vector.load %arg5[%c0_48, %c2_49, %c0_50] : memref<4x18x16xf32, #tpu.memory_space<vmem>>, vector<4x16x16xf32>
    %38 = arith.addf %34, %37 : vector<4x16x16xf32>
    %c0_51 = arith.constant 0 : index
    %c2_52 = arith.constant 2 : index
    %c0_53 = arith.constant 0 : index
    %39 = vector.load %arg6[%c0_51, %c2_52, %c0_53] : memref<4x18x16xf32, #tpu.memory_space<vmem>>, vector<4x16x16xf32>
    %40 = arith.addf %36, %39 : vector<4x16x16xf32>
    %cst_54 = arith.constant 0.13333334 : f32
    %41 = vector.broadcast %cst_54 : f32 to vector<4x16x16xf32>
    %42 = arith.mulf %41, %37 : vector<4x16x16xf32>
    %43 = arith.addf %32, %42 : vector<4x16x16xf32>
    %cst_55 = arith.constant 9.99999993E-9 : f32
    %44 = vector.broadcast %cst_55 : f32 to vector<4x16x16xf32>
    %45 = arith.addf %38, %44 : vector<4x16x16xf32>
    %46 = tpu.reciprocal %45 {approx = true} : vector<4x16x16xf32> -> vector<4x16x16xf32>
    %47 = arith.mulf %45, %46 : vector<4x16x16xf32>
    %cst_56 = arith.constant 2.000000e+00 : f32
    %48 = vector.broadcast %cst_56 : f32 to vector<4x16x16xf32>
    %49 = arith.subf %48, %47 : vector<4x16x16xf32>
    %50 = arith.mulf %46, %49 : vector<4x16x16xf32>
    %51 = arith.mulf %40, %50 : vector<4x16x16xf32>
    %c0_57 = arith.constant 0 : index
    %c0_58 = arith.constant 0 : index
    %c0_59 = arith.constant 0 : index
    %52 = vector.load %arg2[%c0_57, %c0_58, %c0_59] : memref<2x16x16xf32, #tpu.memory_space<vmem>>, vector<1x16x16xf32>
    %53 = vector.shape_cast %52 : vector<1x16x16xf32> to vector<16x16xf32>
    %54 = vector.shape_cast %53 : vector<16x16xf32> to vector<1x16x16xf32>
    %55 = vector.broadcast %54 : vector<1x16x16xf32> to vector<4x16x16xf32>
    %56 = arith.addf %51, %55 : vector<4x16x16xf32>
    %57 = arith.mulf %43, %50 : vector<4x16x16xf32>
    %c1_60 = arith.constant 1 : index
    %c0_61 = arith.constant 0 : index
    %c0_62 = arith.constant 0 : index
    %58 = vector.load %arg2[%c1_60, %c0_61, %c0_62] : memref<2x16x16xf32, #tpu.memory_space<vmem>>, vector<1x16x16xf32>
    %59 = vector.shape_cast %58 : vector<1x16x16xf32> to vector<16x16xf32>
    %60 = vector.shape_cast %59 : vector<16x16xf32> to vector<1x16x16xf32>
    %61 = vector.broadcast %60 : vector<1x16x16xf32> to vector<4x16x16xf32>
    %62 = arith.addf %57, %61 : vector<4x16x16xf32>
    %c0_63 = arith.constant 0 : index
    %c0_64 = arith.constant 0 : index
    %c0_65 = arith.constant 0 : index
    %c0_66 = arith.constant 0 : index
    %63 = vector.load %arg3[%c0_63, %c0_64, %c0_65, %c0_66] : memref<4x2x16x16xf32, #tpu.memory_space<vmem>>, vector<4x1x16x16xf32>
    %64 = vector.shape_cast %63 : vector<4x1x16x16xf32> to vector<4x16x16xf32>
    %65 = vector.shape_cast %56 : vector<4x16x16xf32> to vector<4x1x16x16xf32>
    tpu.vector_store %arg3[%c0_63, %c0_64, %c0_65, %c0_66], %65 {strides = array<i32>} : memref<4x2x16x16xf32, #tpu.memory_space<vmem>>, vector<4x1x16x16xf32>,
    %c0_67 = arith.constant 0 : index
    %c1_68 = arith.constant 1 : index
    %c0_69 = arith.constant 0 : index
    %c0_70 = arith.constant 0 : index
    %66 = vector.load %arg3[%c0_67, %c1_68, %c0_69, %c0_70] : memref<4x2x16x16xf32, #tpu.memory_space<vmem>>, vector<4x1x16x16xf32>
    %67 = vector.shape_cast %66 : vector<4x1x16x16xf32> to vector<4x16x16xf32>
    %68 = vector.shape_cast %62 : vector<4x16x16xf32> to vector<4x1x16x16xf32>
    tpu.vector_store %arg3[%c0_67, %c1_68, %c0_69, %c0_70], %68 {strides = array<i32>} : memref<4x2x16x16xf32, #tpu.memory_space<vmem>>, vector<4x1x16x16xf32>,
    return
  }
  func.func @transform_0(%arg0: i32) -> (i32, i32, i32) {
    %c0_i32 = arith.constant 0 : i32
    %c0_i32_0 = arith.constant 0 : i32
    %c0_i32_1 = arith.constant 0 : i32
    return %arg0, %c0_i32, %c0_i32_0 : i32, i32, i32
  }
  func.func @transform_1(%arg0: i32) -> (i32, i32, i32) {
    %c0_i32 = arith.constant 0 : i32
    %c0_i32_0 = arith.constant 0 : i32
    %c0_i32_1 = arith.constant 0 : i32
    %c0_i32_2 = arith.constant 0 : i32
    return %c0_i32, %c0_i32_0, %c0_i32_1 : i32, i32, i32
  }
  func.func @transform_2(%arg0: i32) -> (i32, i32, i32, i32) {
    %c0_i32 = arith.constant 0 : i32
    %c0_i32_0 = arith.constant 0 : i32
    %c0_i32_1 = arith.constant 0 : i32
    %c0_i32_2 = arith.constant 0 : i32
    return %arg0, %c0_i32, %c0_i32_0, %c0_i32_1 : i32, i32, i32, i32
  }
}

</mosaic_0001>

<bundles_post_ra>
// kernel: tpu_custom_call.1
= control target key start
LH: loop header
LB: loop body
LE: loop exit
PB: predicated region body
PF: predicated region fallthrough
CT: control target
= control target key end

     0   :  { %7 = vsyncpa [#allocation6], 0  ;;  %s1669_s0 = inlined_call_operand.hbm [shape: f32[8,16,16], index: 0, kind: input, shape index: {}]   ;;  %s1670_s1 = inlined_call_operand.hbm [shape: f32[2,16,16], index: 1, kind: input, shape index: {}]   ;;  %s1671_s2 = inlined_call_operand.hbm [shape: f32[8,2,16,16], index: 2, kind: output, shape index: {}]  }
   0x1   :  { %9 = vsyncpa [#allocation6 + $0x1], 0 }
   0x2   :  { %10 = vsyncpa [#allocation9], 0 }
   0x3   :  { %11 = vsyncpa [#allocation7], 0 }
   0x4   :  { %13 = vsyncpa [#allocation7 + $0x1], 0  ;;  %s1157_s9 = smov 0   ;;  %s1159_s10 = smov 0  }
   0x5   :  { %s1161_s11 = smov 0   ;;  %s1163_s12 = smov 0  }
   0x6 LB: > { %s1178_s13 = sadd.s32 4294967295, %s1131_s12   ;;  %s874_s14 = sadd.s32 4294967294, %s1131_s12   ;;  %s1131_s12 = sphi %s1163_s12, %s1681_s12   ;;  %s1127_s11 = sphi %s1161_s11, %s1680_s11   ;;  %s1123_s10 = sphi %s1159_s10, %s1679_s10   ;;  %s1119_s9 = sphi %s1157_s9, %s1678_s9  }
   0x7   : > { %p39_p0 = scmp.ne.s32.totalorder %s1123_s10, %s1119_s9  ;;  %p40_p1 = scmp.eq.s32.totalorder %s1178_s13, 0 }
   0x8   : > { %p84_p2 = scmp.eq.s32.totalorder %s1178_s13, 1  ;;  %p90_p3 = scmp.eq.s32.totalorder %s874_s14, 1 }
   0x9   : > { %p1187_p4 = por %p40_p1, %p39_p0  ;;  %p875_p5 = scmp.ge.s32.totalorder %s1131_s12, 1 }
   0xa   : > { %p1192_p6 = por %p90_p3, %p39_p0  ;;  %p97_p7 = scmp.lt.s32.totalorder %s1131_s12, 3 }
   0xb   : > { %s108_s19 = sshll.u32 %s1670_s1, 4  ;;  %s1133_s21 = smov [#allocation8]   ;;  %s109_s19 = int_to_ptr.hbm [resolvable:$true] %s108_s19 }
   0xc   : > { %p1200_p8 = pnand %p875_p5, %p97_p7  ;;  %s110_s22 = sshll.u32 %s1133_s21, 4  ;;  %s111_s22 = int_to_ptr.vmem [resolvable:$true] %s110_s22 }
   0xd   : > { %s1210_s23 = sadd.s32 1, %s1131_s12   ;;  %s1134_s24 = smov 128  }
   0xe   : > { %p912_p9 = pneg %p1200_p8  ;;  %s1135_s25 = smov 8  }
   0xf   : > { %s23_s26 = ssub.s32 %s1131_s12, %s1210_s23  ;;  %s26_s27 = sadd.s32 1, %s1127_s11 }
  0x10   : > { %p913_p10 = pnand %p912_p9, %p40_p1  ;;  %p24_p12 = scmp.eq.s32.totalorder %s23_s26, 0 }
  0x11   : > { %p33_p13 = scmp.ne.s32.totalorder %s1127_s11, %s1123_s10  ;;  %p34_p0 = scmp.eq.s32.totalorder %s1131_s12, 0 }
  0x12   : > { %915 = dma.hbm_to_vmem [thread:$0]  (!%p913_p10), %s109_s19, 512, %s111_s22, [#allocation9], %s1134_s24, %s1134_s24, %s1135_s25  }
  0x13   : > { %s1222_s28 = scalar_select %p24_p12, %s1127_s11, %s26_s27  }
  0x14   : > { %p1226_p3 = por %p84_p2, %p33_p13  ;;  %p925_p5 = scmp.lt.s32.totalorder %s1131_s12, 2 }
  0x15   : > { %s124_s30 = sand.u32 1, %s1127_s11   ;;  %s901_s3 = sshll.u32 %s1131_s12, 6 }
  0x16   : > { %p35_p7 = por %p34_p0, %p33_p13  ;;  %s878_s4 = sshll.u32 %s124_s30, 6 }
  0x17   : > { %s134_s7 = scalar_lea.hbm %s1669_s0, %s901_s3  ;;  %s128_s14 = scalar_lea.vmem [#allocation5], %s878_s4 }
  0x18   : > { %s135_s8 = sshll.u32 %s134_s7, 4  ;;  %s137_s17 = sshll.u32 %s128_s14, 4  ;;  %s136_s8 = int_to_ptr.hbm [resolvable:$true] %s135_s8  ;;  %s138_s17 = int_to_ptr.vmem [resolvable:$true] %s137_s17 }
  0x19   : > { %p1236_p9 = pnand %p925_p5, %p35_p7  ;;  %s125_s19 = scalar_lea.sflag [#allocation6], %s124_s30 }
  0x1a   : > { %s1031_s21 = sshra.s32 %s136_s8, 4  ;;  %s1038_s3 = scalar_lea.hbm %s1669_s0, 128  ;;  %s1032_s21 = int_to_ptr.hbm [resolvable:$true] %s1031_s21 }
  0x1b   : > { %s1033_s22 = scalar_lea.hbm %s1032_s21, 64  ;;  %p1035_p10 = pneg %p1236_p9 }
  0x1c   : > { %p1034_p2 = scmp.ne.s32.totalorder %s1032_s21, %s1033_s22  ;;  %p1039_p0 = scmp.lt.s32.totalorder %s1032_s21, %s1669_s0 }
  0x1d   : > { %p1040_p5 = scmp.lt.s32.totalorder %s1038_s3, %s1033_s22 }
  0x1e   : > { %p1036_p12 = pnand %p1035_p10, %p1034_p2 }
  0x1f   : > { %p1041_p7 = por %p1040_p5, %p1039_p0 }
  0x20   : > { %p1037_p13 = pneg %p1036_p12 }
  0x22   : > { %p1042_p11 = pnand %p1041_p7, %p1037_p13 }
  0x24   : > { %1045 = shalt.err (!%p1042_p11)
}
  0x25   : > { %919 = dma.hbm_to_vmem [thread:$0]  (!%p1236_p9), %s136_s8, 1024, %s138_s17, %s125_s19, %s1134_s24, %s1134_s24, %s1135_s25  }
  0x26   : > { %149 = sbr.rel (%p1200_p8) target bundleno = 552 (0x228), region = 28  ;;  %s1256_s30 = sand.u32 (!%p1200_p8), 1, %s1123_s10  }
  0x27   : > { %s883_s6 = sshll.u32 (!%p1200_p8), %s1256_s30, 6  ;;  %s152_s7 = scalar_lea.sflag (!%p1200_p8), [#allocation6], %s1256_s30 }
  0x28   : > { %s155_s14 = scalar_lea.vmem (!%p1200_p8), [#allocation5], %s883_s6 }
  0x2b   : > { %1106 = dma.done.wait (%p1187_p4), %s152_s7, 1024  }
  0x2c   : > { %1108 = vsyncadd (%p1187_p4), %s152_s7, 4294966272 }
  0x2d   : > { %1110 = dma.done.wait (%p40_p1), [#allocation9], 512  }
  0x2e   : > { %1112 = vsyncadd (%p40_p1), [#allocation9], 4294966784  ;;  %vm229_vm0 = vcmask 130048   ;;  %v1268_v0 = vld [vmem:[%s155_s14 + $0x10] sm:$0xff]  ;;  %v1270_v1 = vld [vmem:[%s155_s14] sm:$0xff]  ;;  %vm184_vm1 = vcmask 139264  }
  0x2f   : > { %v1272_v2 = vld [vmem:[%s155_s14 + $0x20] sm:$0xff]  ;;  %v236_v3 = vsel %vm229_vm0, %v1268_v0, -inf  ;;  %v230_v4 = vsel %vm229_vm0, %v1270_v1, -inf  ;;  %v1280_v6 = vld [vmem:[%s155_s14 + $0x18] sm:$0xff]  ;;  %v222_v7 = vld [vmem:[%s155_s14 + $0x8] sm:$0xff]  ;;  %vm193_vm2 = vcmask 7168  }
  0x30   : > { %v242_v5 = vsel %vm229_vm0, %v1272_v2, -inf  ;;  %237 = vmax.xlane.f32.xlu1 %v236_v3  ;;  %231 = vmax.xlane.f32.xlu0 %v230_v4  ;;  %v1282_v8 = vld [vmem:[%s155_s14 + $0x28] sm:$0xff]  ;;  %v239_v9 = vsel %vm229_vm0, %v1280_v6, -inf  ;;  %v233_v10 = vsel %vm229_vm0, %v222_v7, -inf  ;;  %v1289_v12 = vld [vmem:[%s155_s14 + $0x38] sm:$0xff]  ;;  %v1291_v13 = vld [vmem:[%s155_s14 + $0x30] sm:$0xff] }
  0x31   : > { %243 = vmax.xlane.f32.xlu2 %v242_v5  ;;  %v245_v11 = vsel %vm229_vm0, %v1282_v8, -inf  ;;  %v251_v14 = vsel %vm229_vm0, %v1289_v12, -inf  ;;  %v248_v15 = vsel %vm229_vm0, %v1291_v13, -inf  ;;  %v1136_v50 = vmov 0.0   ;;  %s1137_s15 = smov 1   ;;  %s1138_s20 = smov 127  }
  0x32   : > { %185 = vst.msk [vmem:[#allocation2] sm:$0x1] %vm184_vm1, %v1136_v50  ;;  %vm207_vm3 = vcmask 146568   ;;  %vm196_vm4 = vcmask 1024   ;;  %vm210_vm5 = vcmask 140424   ;;  %vm338_vm6 = vcmask 138248  }
  0x33   : > { %194 = vst.msk [vmem:[#allocation2] sm:$0xff] %vm193_vm2, %v1136_v50  ;;  %s1139_s24 = smov 126   ;;  %vm553_vm7 = vcmask 123904   ;;  %s885_s25 = sshll.u32 %s1256_s30, 7 }
  0x34   : > { %195 = vst.msk [vmem:[#allocation2 + $0x8] sm:$0xff] %vm193_vm2, %v1136_v50  ;;  %s1539_s8 = scalar_lea.vmem [#allocation10], %s885_s25  ;;  %s903_s17 = sshll.u32 %s1178_s13, 7 }
  0x35   : > { %208 = vst.msk [vmem:[#allocation2] sm:$0xff] %vm207_vm3, %v1136_v50  ;;  %s787_s21 = scalar_lea.hbm %s1671_s2, %s903_s17  ;;  %s788_s13 = sshll.u32 %s1539_s8, 4  ;;  %s789_s13 = int_to_ptr.vmem [resolvable:$true] %s788_s13 }
  0x36   : > { %209 = vst.msk [vmem:[#allocation2 + $0x8] sm:$0xff] %vm207_vm3, %v1136_v50  ;;  %s790_s22 = sshll.u32 %s787_s21, 4  ;;  %s775_s26 = scalar_lea.sflag [#allocation7], %s1256_s30  ;;  %s791_s22 = int_to_ptr.hbm [resolvable:$true] %s790_s22 }
  0x37   : > { %186 = vst.msk [vmem:[#allocation2 + $0x18] sm:$0x1] %vm184_vm1, %v1136_v50  ;;  %s1075_s27 = sshra.s32 %s791_s22, 4  ;;  %s1081_s6 = scalar_lea.hbm %s1671_s2, 256  ;;  %s1076_s27 = int_to_ptr.hbm [resolvable:$true] %s1075_s27 }
  0x38   : > { %240 = vmax.xlane.f32.xlu1 %v239_v9  ;;  %234 = vmax.xlane.f32.xlu0 %v233_v10  ;;  %187 = vst.msk [vmem:[#allocation2 + $0x30] sm:$0x1] %vm184_vm1, %v1136_v50  ;;  %s1077_s3 = scalar_lea.hbm %s1076_s27, 128  ;;  %p1082_p11 = scmp.lt.s32.totalorder %s1076_s27, %s1671_s2 }
  0x39   : > { %246 = vmax.xlane.f32.xlu2 %v245_v11  ;;  %188 = vst.msk [vmem:[#allocation2 + $0x48] sm:$0x1] %vm184_vm1, %v1136_v50  ;;  %p1078_p1 = scmp.ne.s32.totalorder %s1076_s27, %s1077_s3  ;;  %p1083_p9 = scmp.lt.s32.totalorder %s1081_s6, %s1077_s3 }
  0x3a   : > { %189 = vst.msk [vmem:[#allocation2 + $0x11] sm:$0x1] %vm184_vm1, %v1136_v50 }
  0x3b   : > { %190 = vst.msk [vmem:[#allocation2 + $0x29] sm:$0x1] %vm184_vm1, %v1136_v50  ;;  %p1079_p4 = pnand %p1078_p1, %p1226_p3  ;;  %p1084_p2 = por %p1083_p9, %p1082_p11 }
  0x3c   : > { %191 = vst.msk [vmem:[#allocation2 + $0x41] sm:$0x1] %vm184_vm1, %v1136_v50 }
  0x3d   : > { %192 = vst.msk [vmem:[#allocation2 + $0x59] sm:$0x1] %vm184_vm1, %v1136_v50  ;;  %p1080_p8 = pneg %p1079_p4 }
  0x3e   : > { %199 = vst.msk [vmem:[#allocation2 + $0x20] sm:$0xff] %vm193_vm2, %v1136_v50 }
  0x3f   : > { %202 = vst.msk [vmem:[#allocation2 + $0x38] sm:$0xff] %vm193_vm2, %v1136_v50  ;;  %p1085_p10 = pnand %p1084_p2, %p1080_p8 }
  0x40   : > { %252 = vmax.xlane.f32.xlu1 %v251_v14  ;;  %249 = vmax.xlane.f32.xlu0 %v248_v15  ;;  %205 = vst.msk [vmem:[#allocation2 + $0x50] sm:$0xff] %vm193_vm2, %v1136_v50 }
  0x41   : > { %213 = vst.msk [vmem:[#allocation2 + $0x20] sm:$0xff] %vm207_vm3, %v1136_v50 }
  0x42   : > { %198 = vst.msk [vmem:[#allocation2 + $0x18] sm:$0xff] %vm193_vm2, %v1136_v50 }
  0x43   : > { %201 = vst.msk [vmem:[#allocation2 + $0x30] sm:$0xff] %vm193_vm2, %v1136_v50 }
  0x44   : > { %204 = vst.msk [vmem:[#allocation2 + $0x48] sm:$0xff] %vm193_vm2, %v1136_v50 }
  0x45   : > { %216 = vst.msk [vmem:[#allocation2 + $0x38] sm:$0xff] %vm207_vm3, %v1136_v50 }
  0x46   : > { %219 = vst.msk [vmem:[#allocation2 + $0x50] sm:$0xff] %vm207_vm3, %v1136_v50 }
  0x47   : > { %212 = vst.msk [vmem:[#allocation2 + $0x18] sm:$0xff] %vm207_vm3, %v1136_v50 }
  0x48   : > { %215 = vst.msk [vmem:[#allocation2 + $0x30] sm:$0xff] %vm207_vm3, %v1136_v50 }
  0x49   : > { %218 = vst.msk [vmem:[#allocation2 + $0x48] sm:$0xff] %vm207_vm3, %v1136_v50 }
  0x4a   : > { %200 = vst.msk [vmem:[#allocation2 + $0x28] sm:$0x3] %vm196_vm4, %v1136_v50 }
  0x4b   : > { %214 = vst.msk [vmem:[#allocation2 + $0x28] sm:$0x3] %vm210_vm5, %v1136_v50 }
  0x4c   : > { %197 = vst.msk [vmem:[#allocation2 + $0x10] sm:$0x3] %vm196_vm4, %v1136_v50 }
  0x4d   : > { %203 = vst.msk [vmem:[#allocation2 + $0x40] sm:$0x3] %vm196_vm4, %v1136_v50 }
  0x4e   : > { %206 = vst.msk [vmem:[#allocation2 + $0x58] sm:$0x3] %vm196_vm4, %v1136_v50 }
  0x4f   : > { %211 = vst.msk [vmem:[#allocation2 + $0x10] sm:$0x3] %vm210_vm5, %v1136_v50 }
  0x50   : > { %217 = vst.msk [vmem:[#allocation2 + $0x40] sm:$0x3] %vm210_vm5, %v1136_v50 }
  0x51   : > { %220 = vst.msk [vmem:[#allocation2 + $0x58] sm:$0x3] %vm210_vm5, %v1136_v50 }
  0xa3   : > { %v238_v16 = vpop.xlane.xlu1 %237  ;;  %v232_v17 = vpop.xlane.xlu0 %231 }
  0xa4   : > { %v244_v18 = vpop.xlane.xlu2 %243 }
  0xab   : > { %v241_v19 = vpop.xlane.xlu1 %240  ;;  %v235_v20 = vpop.xlane.xlu0 %234 }
  0xac   : > { %v261_v21 = vmax.f32 %v238_v16, %v241_v19  ;;  %v254_v22 = vmax.f32 %v232_v17, %v235_v20  ;;  %v247_v23 = vpop.xlane.xlu2 %246 }
  0xad   : > { %v268_v24 = vmax.f32 %v244_v18, %v247_v23 }
  0xae   : > { %v262_v25 = vrot.slane %v261_v21, 4  ;;  %v255_v26 = vrot.slane %v254_v22, 4 }
  0xaf   : > { %v269_v27 = vrot.slane %v268_v24, 4 }
  0xb0   : > { %v263_v28 = vmax.f32 %v261_v21, %v262_v25  ;;  %v256_v29 = vmax.f32 %v254_v22, %v255_v26 }
  0xb1   : > { %v270_v30 = vmax.f32 %v268_v24, %v269_v27 }
  0xb2   : > { %v264_v31 = vrot.slane %v263_v28, 2  ;;  %v257_v32 = vrot.slane %v256_v29, 2 }
  0xb3   : > { %v271_v33 = vrot.slane %v270_v30, 2  ;;  %v253_v34 = vpop.xlane.xlu1 %252  ;;  %v250_v35 = vpop.xlane.xlu0 %249 }
  0xb4   : > { %v265_v36 = vmax.f32 %v263_v28, %v264_v31  ;;  %v258_v37 = vmax.f32 %v256_v29, %v257_v32  ;;  %v275_v38 = vmax.f32 %v250_v35, %v253_v34 }
  0xb5   : > { %v272_v39 = vmax.f32 %v270_v30, %v271_v33 }
  0xb6   : > { %v266_v40 = vrot.slane %v265_v36, 1  ;;  %v259_v41 = vrot.slane %v258_v37, 1  ;;  %v276_v42 = vrot.slane %v275_v38, 4 }
  0xb7   : > { %v273_v46 = vrot.slane %v272_v39, 1 }
  0xb8   : > { %v267_v43 = vmax.f32 %v265_v36, %v266_v40  ;;  %v260_v44 = vmax.f32 %v258_v37, %v259_v41  ;;  %v277_v45 = vmax.f32 %v275_v38, %v276_v42 }
  0xb9   : > { %v274_v55 = vmax.f32 %v272_v39, %v273_v46 }
  0xba   : > { %v284_v47 = vsub.f32 %v1268_v0, %v267_v43  ;;  %v282_v48 = vsub.f32 %v1270_v1, %v260_v44  ;;  %v283_v49 = vsub.f32 %v222_v7, %v260_v44  ;;  %v278_v51 = vrot.slane %v277_v45, 2 }
  0xbb   : > { %v285_v58 = vsub.f32 %v1280_v6, %v267_v43  ;;  %v286_v59 = vsub.f32 %v1272_v2, %v274_v55  ;;  %v287_v5 = vsub.f32 %v1282_v8, %v274_v55 }
  0xbc   : > { %v294_v52 = vmul.f32 1.442695, %v284_v47  ;;  %v290_v53 = vmul.f32 1.442695, %v282_v48  ;;  %v292_v54 = vmul.f32 1.442695, %v283_v49  ;;  %v279_v56 = vmax.f32 %v277_v45, %v278_v51 }
  0xbd   : > { %v296_v63 = vmul.f32 1.442695, %v285_v58  ;;  %v298_v0 = vmul.f32 1.442695, %v286_v59  ;;  %v300_v7 = vmul.f32 1.442695, %v287_v5 }
  0xbe   : > { %969 = vpow2.f32 %v294_v52  ;;  %v280_v57 = vrot.slane %v279_v56, 1 }
  0xbf   : > { %971 = vpow2.f32 %v290_v53 }
  0xc0   : > { %973 = vpow2.f32 %v292_v54  ;;  %v281_v60 = vmax.f32 %v279_v56, %v280_v57 }
  0xc2   : > { %v288_v61 = vsub.f32 %v1291_v13, %v281_v60  ;;  %v289_v4 = vsub.f32 %v1289_v12, %v281_v60 }
  0xc4   : > { %v970_v62 = vpop.eup %969  ;;  %v302_v1 = vmul.f32 1.442695, %v288_v61  ;;  %v304_v6 = vmul.f32 1.442695, %v289_v4 }
  0xc5   : > { %318 = vrot.lane.b32.xlu1 %v970_v62, %s1137_s15  ;;  %v972_v2 = vpop.eup %971 }
  0xc6   : > { %v974_v3 = vpop.eup %973  ;;  %975 = vpow2.f32 %v302_v1  ;;  %314 = vrot.lane.b32.xlu2 %v972_v2, %s1137_s15 }
  0xc7   : > { %977 = vpow2.f32 %v296_v63  ;;  %316 = vrot.lane.b32.xlu0 %v974_v3, %s1137_s15 }
  0xc8   : > { %979 = vpow2.f32 %v298_v0 }
  0xc9   : > { %981 = vpow2.f32 %v304_v6 }
  0xca   : > { %983 = vpow2.f32 %v300_v7 }
  0xcc   : > { %v976_v8 = vpop.eup %975 }
  0xcd   : > { %v978_v9 = vpop.eup %977  ;;  %326 = vrot.lane.b32.xlu1 %v976_v8, %s1137_s15 }
  0xce   : > { %v980_v10 = vpop.eup %979  ;;  %320 = vrot.lane.b32.xlu2 %v978_v9, %s1137_s15 }
  0xcf   : > { %322 = vrot.lane.b32.xlu0 %v980_v10, %s1137_s15  ;;  %v982_v11 = vpop.eup %981 }
  0xd0   : > { %v984_v12 = vpop.eup %983 }
  0xd6   : > { %324 = vrot.lane.b32.xlu2 %v984_v12, %s1137_s15 }
  0xd7   : > { %328 = vrot.lane.b32.xlu0 %v982_v11, %s1137_s15 }
 0x120   : > { %v315_v13 = vpop.permute.xlu2 %314 }
 0x121   : > { %339 = vst.msk [vmem:[#allocation2 + $0x1] sm:$0xff] %vm338_vm6, %v315_v13 }
 0x128   : > { %v321_v14 = vpop.permute.xlu2 %320  ;;  %v1369_v15 = vld [vmem:[#allocation2] sm:$0xff] }
 0x129   : > { %342 = vst.msk [vmem:[#allocation2 + $0x21] sm:$0xff] %vm338_vm6, %v321_v14  ;;  %383 = vrot.lane.b32.xlu2 %v1369_v15, %s1138_s20  ;;  %v479_v33 = vmul.f32 0.13333334, %v1369_v15  ;;  %v359_v9 = vmul.f32 -0.13333334, %v1369_v15 }
 0x130   : > { %v325_v16 = vpop.permute.xlu2 %324  ;;  %v1391_v24 = vld [vmem:[#allocation2 + $0x28] sm:$0x3] }
 0x131   : > { %344 = vst.msk [vmem:[#allocation2 + $0x39] sm:$0xff] %vm338_vm6, %v325_v16  ;;  %v484_v37 = vmul.f32 0.13333334, %v1391_v24 }
 0x137   : > { %v319_v17 = vpop.permute.xlu1 %318 }
 0x138   : > { %341 = vst.msk [vmem:[#allocation2 + $0x19] sm:$0xff] %vm338_vm6, %v319_v17  ;;  %v1406_v29 = vld [vmem:[#allocation2 + $0x40] sm:$0x3] }
 0x139   : > { %v317_v18 = vpop.permute.xlu0 %316  ;;  %v487_v40 = vmul.f32 0.13333334, %v1406_v29 }
 0x13a   : > { %340 = vst.msk [vmem:[#allocation2 + $0x9] sm:$0xff] %vm338_vm6, %v317_v18 }
 0x13f   : > { %v1377_v19 = vld [vmem:[#allocation2 + $0x18] sm:$0xff]  ;;  %v327_v20 = vpop.permute.xlu1 %326  ;;  %v1393_v25 = vld [vmem:[#allocation2 + $0x20] sm:$0xff] }
 0x140   : > { %389 = vrot.lane.b32.xlu2 %v1377_v19, %s1138_s20  ;;  %345 = vst.msk [vmem:[#allocation2 + $0x49] sm:$0xff] %vm338_vm6, %v327_v20  ;;  %v482_v36 = vmul.f32 0.13333334, %v1377_v19  ;;  %v483_v38 = vmul.f32 0.13333334, %v1393_v25 }
 0x141   : > { %v323_v21 = vpop.permute.xlu0 %322  ;;  %v1382_v22 = vld [vmem:[#allocation2 + $0x10] sm:$0x3]  ;;  %v1384_v23 = vld [vmem:[#allocation2 + $0x8] sm:$0xff]  ;;  %v362_v20 = vmul.f32 -0.13333334, %v1377_v19 }
 0x142   : > { %343 = vst.msk [vmem:[#allocation2 + $0x31] sm:$0xff] %vm338_vm6, %v323_v21  ;;  %387 = vrot.lane.b32.xlu0 %v1382_v22, %s1138_s20  ;;  %385 = vrot.lane.b32.xlu1 %v1384_v23, %s1138_s20  ;;  %v481_v34 = vmul.f32 0.13333334, %v1382_v22  ;;  %v480_v35 = vmul.f32 0.13333334, %v1384_v23 }
 0x147   : > { %v1404_v28 = vld [vmem:[#allocation2 + $0x48] sm:$0xff] }
 0x148   : > { %v488_v42 = vmul.f32 0.13333334, %v1404_v28 }
 0x149   : > { %v1395_v26 = vld [vmem:[#allocation2 + $0x30] sm:$0xff]  ;;  %v329_v27 = vpop.permute.xlu0 %328  ;;  %v1408_v30 = vld [vmem:[#allocation2 + $0x38] sm:$0xff] }
 0x14a   : > { %393 = vrot.lane.b32.xlu0 %v1391_v24, %s1138_s20  ;;  %391 = vrot.lane.b32.xlu1 %v1393_v25, %s1138_s20  ;;  %346 = vst.msk [vmem:[#allocation2 + $0x51] sm:$0xff] %vm338_vm6, %v329_v27  ;;  %v485_v39 = vmul.f32 0.13333334, %v1395_v26  ;;  %v486_v41 = vmul.f32 0.13333334, %v1408_v30 }
 0x14b   : > { %395 = vrot.lane.b32.xlu2 %v1395_v26, %s1138_s20 }
 0x151   : > { %v1416_v31 = vld [vmem:[#allocation2 + $0x58] sm:$0x3]  ;;  %v1418_v32 = vld [vmem:[#allocation2 + $0x50] sm:$0xff] }
 0x152   : > { %399 = vrot.lane.b32.xlu0 %v1406_v29, %s1138_s20  ;;  %397 = vrot.lane.b32.xlu1 %v1408_v30, %s1138_s20  ;;  %v490_v44 = vmul.f32 0.13333334, %v1416_v31  ;;  %v489_v45 = vmul.f32 0.13333334, %v1418_v32 }
 0x153   : > { %401 = vrot.lane.b32.xlu2 %v1404_v28, %s1138_s20 }
 0x15a   : > { %405 = vrot.lane.b32.xlu0 %v1416_v31, %s1138_s20  ;;  %403 = vrot.lane.b32.xlu1 %v1418_v32, %s1138_s20 }
 0x15b   : > { %431 = vrot.lane.b32.xlu2 %v1369_v15, %s1139_s24 }
 0x162   : > { %435 = vrot.lane.b32.xlu0 %v1382_v22, %s1139_s24  ;;  %433 = vrot.lane.b32.xlu1 %v1384_v23, %s1139_s24 }
 0x163   : > { %437 = vrot.lane.b32.xlu2 %v1377_v19, %s1139_s24 }
 0x16a   : > { %441 = vrot.lane.b32.xlu0 %v1391_v24, %s1139_s24  ;;  %439 = vrot.lane.b32.xlu1 %v1393_v25, %s1139_s24 }
 0x16b   : > { %443 = vrot.lane.b32.xlu2 %v1395_v26, %s1139_s24 }
 0x172   : > { %447 = vrot.lane.b32.xlu0 %v1406_v29, %s1139_s24  ;;  %445 = vrot.lane.b32.xlu1 %v1408_v30, %s1139_s24 }
 0x173   : > { %449 = vrot.lane.b32.xlu2 %v1404_v28, %s1139_s24 }
 0x17a   : > { %453 = vrot.lane.b32.xlu0 %v1416_v31, %s1139_s24  ;;  %451 = vrot.lane.b32.xlu1 %v1418_v32, %s1139_s24 }
 0x17b   : > { %503 = vrot.lane.b32.xlu2 %v479_v33, %s1139_s24 }
 0x182   : > { %507 = vrot.lane.b32.xlu0 %v481_v34, %s1139_s24  ;;  %505 = vrot.lane.b32.xlu1 %v480_v35, %s1139_s24 }
 0x183   : > { %509 = vrot.lane.b32.xlu2 %v482_v36, %s1139_s24  ;;  %v384_v43 = vpop.permute.xlu2 %383 }
 0x184   : > { %v419_v49 = vadd.f32 %v384_v43, %v1369_v15 }
 0x18a   : > { %513 = vrot.lane.b32.xlu0 %v484_v37, %s1139_s24  ;;  %511 = vrot.lane.b32.xlu1 %v483_v38, %s1139_s24 }
 0x18b   : > { %515 = vrot.lane.b32.xlu2 %v485_v39, %s1139_s24 }
 0x192   : > { %519 = vrot.lane.b32.xlu0 %v487_v40, %s1139_s24  ;;  %517 = vrot.lane.b32.xlu1 %v486_v41, %s1139_s24 }
 0x193   : > { %521 = vrot.lane.b32.xlu2 %v488_v42, %s1139_s24 }
 0x19a   : > { %525 = vrot.lane.b32.xlu0 %v490_v44, %s1139_s24  ;;  %523 = vrot.lane.b32.xlu1 %v489_v45, %s1139_s24  ;;  %v390_v46 = vpop.permute.xlu2 %389 }
 0x19b   : > { %v422_v54 = vadd.f32 %v390_v46, %v1377_v19 }
 0x1a5   : > { %v396_v47 = vpop.permute.xlu2 %395 }
 0x1a6   : > { %v425_v59 = vadd.f32 %v396_v47, %v1395_v26 }
 0x1ad   : > { %v402_v48 = vpop.permute.xlu2 %401 }
 0x1ae   : > { %v428_v0 = vadd.f32 %v402_v48, %v1404_v28 }
 0x1b4   : > { %v388_v50 = vpop.permute.xlu0 %387  ;;  %v386_v51 = vpop.permute.xlu1 %385 }
 0x1b5   : > { %v432_v52 = vpop.permute.xlu2 %431  ;;  %v421_v5 = vadd.f32 %v388_v50, %v1382_v22  ;;  %v420_v6 = vadd.f32 %v386_v51, %v1384_v23 }
 0x1b6   : > { %v467_v53 = vadd.f32 %v432_v52, %v419_v49  ;;  %v365_v49 = vmul.f32 -0.13333334, %v1395_v26 }
 0x1b8   : > { %551 = vst.msk [vmem:[#allocation3] sm:$0xff] %vm229_vm0, %v467_v53 }
 0x1bc   : > { %v394_v55 = vpop.permute.xlu0 %393  ;;  %v392_v56 = vpop.permute.xlu1 %391 }
 0x1bd   : > { %v438_v57 = vpop.permute.xlu2 %437  ;;  %v424_v14 = vadd.f32 %v394_v55, %v1391_v24  ;;  %v423_v16 = vadd.f32 %v392_v56, %v1393_v25 }
 0x1be   : > { %v470_v58 = vadd.f32 %v438_v57, %v422_v54 }
 0x1bf   : > { %v576_v33 = vld [vmem:[#allocation3] sm:$0xff] }
 0x1c0   : > { %555 = vst.msk [vmem:[#allocation3 + $0x18] sm:$0xff] %vm229_vm0, %v470_v58 }
 0x1c4   : > { %v400_v60 = vpop.permute.xlu0 %399  ;;  %v398_v61 = vpop.permute.xlu1 %397 }
 0x1c5   : > { %v444_v62 = vpop.permute.xlu2 %443  ;;  %v427_v43 = vadd.f32 %v400_v60, %v1406_v29  ;;  %v426_v44 = vadd.f32 %v398_v61, %v1408_v30 }
 0x1c6   : > { %v473_v63 = vadd.f32 %v444_v62, %v425_v59 }
 0x1c7   : > { %v1499_v53 = vld [vmem:[#allocation3 + $0x18] sm:$0xff] }
 0x1c8   : > { %558 = vst.msk [vmem:[#allocation3 + $0x30] sm:$0xff] %vm229_vm0, %v473_v63  ;;  %v592_v63 = vmul.f32 -0.13333334, %v576_v33 }
 0x1cc   : > { %v1479_v1 = vpop.permute.xlu0 %405  ;;  %v1481_v2 = vpop.permute.xlu1 %403 }
 0x1cd   : > { %v450_v3 = vpop.permute.xlu2 %449 }
 0x1ce   : > { %v476_v4 = vadd.f32 %v450_v3, %v428_v0  ;;  %v430_v0 = vadd.f32 %v1479_v1, %v1416_v31  ;;  %v429_v3 = vadd.f32 %v1481_v2, %v1418_v32 }
 0x1d0   : > { %561 = vst.msk [vmem:[#allocation3 + $0x48] sm:$0xff] %vm229_vm0, %v476_v4  ;;  %v368_v4 = vmul.f32 -0.13333334, %v1404_v28 }
 0x1d4   : > { %v436_v7 = vpop.permute.xlu0 %435  ;;  %v434_v8 = vpop.permute.xlu1 %433 }
 0x1d5   : > { %v469_v10 = vadd.f32 %v436_v7, %v421_v5  ;;  %v468_v11 = vadd.f32 %v434_v8, %v420_v6  ;;  %v504_v12 = vpop.permute.xlu2 %503 }
 0x1d6   : > { %v539_v13 = vadd.f32 %v504_v12, %v359_v9 }
 0x1d7   : > { %554 = vst.msk [vmem:[#allocation3 + $0x10] sm:$0x3] %vm553_vm7, %v469_v10 }
 0x1d8   : > { %552 = vst.msk [vmem:[#allocation3 + $0x8] sm:$0xff] %vm229_vm0, %v468_v11 }
 0x1d9   : > { %564 = vst.msk [vmem:[#allocation4] sm:$0xff] %vm229_vm0, %v539_v13 }
 0x1dc   : > { %v442_v17 = vpop.permute.xlu0 %441  ;;  %v440_v18 = vpop.permute.xlu1 %439 }
 0x1dd   : > { %v472_v21 = vadd.f32 %v442_v17, %v424_v14  ;;  %v471_v15 = vadd.f32 %v440_v18, %v423_v16  ;;  %v510_v27 = vpop.permute.xlu2 %509  ;;  %v1510_v18 = vld [vmem:[#allocation3 + $0x30] sm:$0xff] }
 0x1de   : > { %v542_v34 = vadd.f32 %v510_v27, %v362_v20 }
 0x1df   : > { %v577_v35 = vld [vmem:[#allocation3 + $0x8] sm:$0xff]  ;;  %557 = vst.msk [vmem:[#allocation3 + $0x28] sm:$0x3] %vm553_vm7, %v472_v21 }
 0x1e0   : > { %v600_v36 = vld [vmem:[#allocation3 + $0x1] sm:$0xff]  ;;  %v601_v37 = vld [vmem:[#allocation3 + $0x9] sm:$0xff]  ;;  %556 = vst.msk [vmem:[#allocation3 + $0x20] sm:$0xff] %vm229_vm0, %v471_v15  ;;  %v593_v6 = vmul.f32 -0.13333334, %v577_v35 }
 0x1e1   : > { %v608_v38 = vadd.f32 %v600_v36, %v576_v33  ;;  %v609_v39 = vadd.f32 %v601_v37, %v577_v35  ;;  %v632_v40 = vld [vmem:[#allocation3 + $0x2] sm:$0xff]  ;;  %v633_v41 = vld [vmem:[#allocation3 + $0xa] sm:$0xff]  ;;  %567 = vst.msk [vmem:[#allocation4 + $0x18] sm:$0xff] %vm229_vm0, %v542_v34 }
 0x1e2   : > { %v664_v12 = vmul.f32 0.13333334, %v632_v40  ;;  %v665_v1 = vmul.f32 0.13333334, %v633_v41 }
 0x1e3   : > { %v640_v42 = vadd.f32 %v632_v40, %v608_v38  ;;  %v641_v19 = vadd.f32 %v633_v41, %v609_v39  ;;  %v361_v40 = vmul.f32 -0.13333334, %v1382_v22  ;;  %v1522_v41 = vld [vmem:[#allocation8 + $0x10] sm:$0xff] }
 0x1e4   : > { %v448_v47 = vpop.permute.xlu0 %447  ;;  %v446_v48 = vpop.permute.xlu1 %445  ;;  %v672_v36 = vadd.f32 %v664_v12, %v592_v63 }
 0x1e5   : > { %v680_v45 = vadd.f32 1e-08, %v640_v42  ;;  %v681_v46 = vadd.f32 1e-08, %v641_v19  ;;  %v475_v50 = vadd.f32 %v448_v47, %v427_v43  ;;  %v474_v51 = vadd.f32 %v446_v48, %v426_v44  ;;  %v516_v52 = vpop.permute.xlu2 %515 }
 0x1e6   : > { %v545_v54 = vadd.f32 %v516_v52, %v365_v49  ;;  %v673_v42 = vadd.f32 %v665_v1, %v593_v6  ;;  %v360_v48 = vmul.f32 -0.13333334, %v1384_v23 }
 0x1e7   : > { %985 = vrcp.f32 %v680_v45  ;;  %v579_v55 = vld [vmem:[#allocation3 + $0x20] sm:$0xff]  ;;  %560 = vst.msk [vmem:[#allocation3 + $0x40] sm:$0x3] %vm553_vm7, %v475_v50 }
 0x1e8   : > { %987 = vrcp.f32 %v681_v46  ;;  %v602_v56 = vld [vmem:[#allocation3 + $0x19] sm:$0xff]  ;;  %v603_v57 = vld [vmem:[#allocation3 + $0x21] sm:$0xff]  ;;  %559 = vst.msk [vmem:[#allocation3 + $0x38] sm:$0xff] %vm229_vm0, %v474_v51  ;;  %v595_v47 = vmul.f32 -0.13333334, %v579_v55 }
 0x1e9   : > { %v610_v58 = vadd.f32 %v602_v56, %v1499_v53  ;;  %v611_v59 = vadd.f32 %v603_v57, %v579_v55  ;;  %v634_v60 = vld [vmem:[#allocation3 + $0x1a] sm:$0xff]  ;;  %v635_v26 = vld [vmem:[#allocation3 + $0x22] sm:$0xff]  ;;  %570 = vst.msk [vmem:[#allocation4 + $0x30] sm:$0xff] %vm229_vm0, %v545_v54 }
 0x1ea   : > { %v666_v22 = vmul.f32 0.13333334, %v634_v60 }
 0x1eb   : > { %v642_v61 = vadd.f32 %v634_v60, %v610_v58  ;;  %v643_v62 = vadd.f32 %v635_v26, %v611_v59  ;;  %v667_v59 = vmul.f32 0.13333334, %v635_v26 }
 0x1ec   : > { %v454_v9 = vpop.permute.xlu0 %453  ;;  %v452_v10 = vpop.permute.xlu1 %451 }
 0x1ed   : > { %v986_v5 = vpop.eup %985  ;;  %v682_v7 = vadd.f32 1e-08, %v642_v61  ;;  %v683_v8 = vadd.f32 1e-08, %v643_v62  ;;  %v478_v14 = vadd.f32 %v454_v9, %v430_v0  ;;  %v477_v16 = vadd.f32 %v452_v10, %v429_v3  ;;  %v522_v17 = vpop.permute.xlu2 %521  ;;  %v1535_v3 = vld [vmem:[#allocation3 + $0x48] sm:$0xff] }
 0x1ee   : > { %v988_v11 = vpop.eup %987  ;;  %v696_v13 = vmul.f32 %v986_v5, %v680_v45  ;;  %v548_v2 = vadd.f32 %v522_v17, %v368_v4  ;;  %v1527_v45 = vld [vmem:[#allocation8 + $0x18] sm:$0xff]  ;;  %v594_v0 = vmul.f32 -0.13333334, %v1499_v53  ;;  %v675_v10 = vadd.f32 %v667_v59, %v595_v47 }
 0x1ef   : > { %v697_v20 = vmul.f32 %v988_v11, %v681_v46  ;;  %989 = vrcp.f32 %v682_v7  ;;  %v1512_v21 = vld [vmem:[#allocation3 + $0x38] sm:$0xff]  ;;  %563 = vst.msk [vmem:[#allocation3 + $0x58] sm:$0x3] %vm553_vm7, %v478_v14  ;;  %v364_v14 = vmul.f32 -0.13333334, %v1391_v24 }
 0x1f0   : > { %v704_v28 = vsub.f32 2.0, %v696_v13  ;;  %991 = vrcp.f32 %v683_v8  ;;  %v604_v15 = vld [vmem:[#allocation3 + $0x31] sm:$0xff]  ;;  %v605_v27 = vld [vmem:[#allocation3 + $0x39] sm:$0xff]  ;;  %562 = vst.msk [vmem:[#allocation3 + $0x50] sm:$0xff] %vm229_vm0, %v477_v16 }
 0x1f1   : > { %v705_v33 = vsub.f32 2.0, %v697_v20  ;;  %v612_v34 = vadd.f32 %v604_v15, %v1510_v18  ;;  %v613_v35 = vadd.f32 %v605_v27, %v1512_v21  ;;  %v636_v38 = vld [vmem:[#allocation3 + $0x32] sm:$0xff]  ;;  %v637_v39 = vld [vmem:[#allocation3 + $0x3a] sm:$0xff]  ;;  %573 = vst.msk [vmem:[#allocation4 + $0x48] sm:$0xff] %vm229_vm0, %v548_v2  ;;  %v363_v20 = vmul.f32 -0.13333334, %v1393_v25 }
 0x1f2   : > { %v1518_v37 = vmul.f32 %v986_v5, %v704_v28  ;;  %v597_v15 = vmul.f32 -0.13333334, %v1512_v21  ;;  %v668_v27 = vmul.f32 0.13333334, %v636_v38 }
 0x1f3   : > { %v1524_v19 = vmul.f32 %v988_v11, %v705_v33  ;;  %v644_v43 = vadd.f32 %v636_v38, %v612_v34  ;;  %v645_v44 = vadd.f32 %v637_v39, %v613_v35  ;;  %v669_v33 = vmul.f32 0.13333334, %v637_v39  ;;  %v584_v38 = vld [vmem:[#allocation4] sm:$0xff] }
 0x1f4   : > { %v738_v46 = vmul.f32 %v1518_v37, %v672_v36  ;;  %v508_v54 = vpop.permute.xlu0 %507  ;;  %v506_v56 = vpop.permute.xlu1 %505 }
 0x1f5   : > { %v990_v49 = vpop.eup %989  ;;  %v739_v50 = vmul.f32 %v1524_v19, %v673_v42  ;;  %v684_v51 = vadd.f32 1e-08, %v644_v43  ;;  %v685_v52 = vadd.f32 1e-08, %v645_v44  ;;  %v540_v62 = vadd.f32 %v506_v56, %v360_v48 }
 0x1f6   : > { %v992_v57 = vpop.eup %991  ;;  %v749_v58 = vadd.f32 %v1522_v41, %v738_v46  ;;  %v698_v61 = vmul.f32 %v990_v49, %v682_v7  ;;  %v541_v23 = vadd.f32 %v508_v54, %v361_v40  ;;  %v674_v7 = vadd.f32 %v666_v22, %v594_v0 }
 0x1f7   : > { %v750_v63 = vadd.f32 %v1527_v45, %v739_v50  ;;  %v699_v55 = vmul.f32 %v992_v57, %v683_v8  ;;  %993 = vrcp.f32 %v684_v51  ;;  %v1545_v4 = vld [vmem:[#allocation3 + $0x50] sm:$0xff]  ;;  %565 = vst.msk [vmem:[#allocation4 + $0x8] sm:$0xff] %vm229_vm0, %v540_v62  ;;  %v596_v48 = vmul.f32 -0.13333334, %v1510_v18 }
 0x1f8   : > { %886 = vst.msk [vmem:[%s1539_s8 + $0x10] sm:$0xff] %vm229_vm0, %v749_v58  ;;  %v706_v60 = vsub.f32 2.0, %v698_v61  ;;  %995 = vrcp.f32 %v685_v52  ;;  %v606_v5 = vld [vmem:[#allocation3 + $0x49] sm:$0xff]  ;;  %v607_v6 = vld [vmem:[#allocation3 + $0x51] sm:$0xff]  ;;  %v677_v56 = vadd.f32 %v669_v33, %v597_v15  ;;  %v367_v0 = vmul.f32 -0.13333334, %v1406_v29 }
 0x1f9   : > { %887 = vst.msk [vmem:[%s1539_s8 + $0x18] sm:$0xff] %vm229_vm0, %v750_v63  ;;  %v707_v26 = vsub.f32 2.0, %v699_v55  ;;  %v614_v8 = vadd.f32 %v606_v5, %v1535_v3  ;;  %v615_v9 = vadd.f32 %v607_v6, %v1545_v4  ;;  %v638_v12 = vld [vmem:[#allocation3 + $0x4a] sm:$0xff]  ;;  %v1554_v13 = vld [vmem:[#allocation3 + $0x52] sm:$0xff]  ;;  %v676_v22 = vadd.f32 %v668_v27, %v596_v48  ;;  %v1578_v55 = vld [vmem:[#allocation8] sm:$0xff] }
 0x1fa   : > { %v1547_v53 = vmul.f32 %v990_v49, %v706_v60  ;;  %566 = vst.msk [vmem:[#allocation4 + $0x10] sm:$0x3] %vm553_vm7, %v541_v23 }
 0x1fb   : > { %v1552_v11 = vmul.f32 %v992_v57, %v707_v26  ;;  %v646_v17 = vadd.f32 %v638_v12, %v614_v8  ;;  %v647_v1 = vadd.f32 %v1554_v13, %v615_v9  ;;  %v1583_v8 = vld [vmem:[#allocation8 + $0x8] sm:$0xff] }
 0x1fc   : > { %v740_v16 = vmul.f32 %v1547_v53, %v674_v7  ;;  %v514_v34 = vpop.permute.xlu0 %513  ;;  %v512_v35 = vpop.permute.xlu1 %511  ;;  %v599_v7 = vmul.f32 -0.13333334, %v1545_v4 }
 0x1fd   : > { %v994_v2 = vpop.eup %993  ;;  %v741_v28 = vmul.f32 %v1552_v11, %v675_v10  ;;  %v686_v42 = vadd.f32 1e-08, %v646_v17  ;;  %v687_v43 = vadd.f32 1e-08, %v647_v1  ;;  %v544_v46 = vadd.f32 %v514_v34, %v364_v14 }
 0x1fe   : > { %v996_v36 = vpop.eup %995  ;;  %v751_v24 = vadd.f32 %v1522_v41, %v740_v16  ;;  %v700_v40 = vmul.f32 %v994_v2, %v684_v51  ;;  %v543_v47 = vadd.f32 %v512_v35, %v363_v20  ;;  %v585_v49 = vld [vmem:[#allocation4 + $0x8] sm:$0xff]  ;;  %v366_v10 = vmul.f32 -0.13333334, %v1408_v30  ;;  %v586_v30 = vld [vmem:[#allocation4 + $0x18] sm:$0xff] }
 0x1ff   : > { %v752_v44 = vadd.f32 %v1527_v45, %v741_v28  ;;  %v701_v25 = vmul.f32 %v996_v36, %v685_v52  ;;  %997 = vrcp.f32 %v686_v42  ;;  %v616_v50 = vld [vmem:[#allocation4 + $0x1] sm:$0xff]  ;;  %569 = vst.msk [vmem:[#allocation4 + $0x28] sm:$0x3] %vm553_vm7, %v544_v46  ;;  %v670_v17 = vmul.f32 0.13333334, %v638_v12 }
 0x200   : > { %888 = vst.msk [vmem:[%s1539_s8 + $0x30] sm:$0xff] %vm229_vm0, %v751_v24  ;;  %v708_v21 = vsub.f32 2.0, %v700_v40  ;;  %999 = vrcp.f32 %v687_v43  ;;  %v624_v52 = vadd.f32 %v616_v50, %v584_v38  ;;  %v648_v58 = vld [vmem:[#allocation4 + $0x2] sm:$0xff]  ;;  %v671_v20 = vmul.f32 0.13333334, %v1554_v13 }
 0x201   : > { %889 = vst.msk [vmem:[%s1539_s8 + $0x38] sm:$0xff] %vm229_vm0, %v752_v44  ;;  %v709_v39 = vsub.f32 2.0, %v701_v25  ;;  %v617_v54 = vld [vmem:[#allocation4 + $0x9] sm:$0xff]  ;;  %v370_v25 = vmul.f32 -0.13333334, %v1416_v31 }
 0x202   : > { %v1570_v51 = vmul.f32 %v994_v2, %v708_v21  ;;  %v625_v57 = vadd.f32 %v617_v54, %v585_v49  ;;  %568 = vst.msk [vmem:[#allocation4 + $0x20] sm:$0xff] %vm229_vm0, %v543_v47  ;;  %v649_v61 = vld [vmem:[#allocation4 + $0xa] sm:$0xff]  ;;  %v656_v62 = vadd.f32 %v648_v58, %v624_v52  ;;  %v369_v31 = vmul.f32 -0.13333334, %v1418_v32 }
 0x203   : > { %v1573_v18 = vmul.f32 %v996_v36, %v709_v39 }
 0x204   : > { %v742_v59 = vmul.f32 %v1570_v51, %v676_v22  ;;  %v657_v23 = vadd.f32 %v649_v61, %v625_v57  ;;  %v520_v60 = vpop.permute.xlu0 %519  ;;  %v518_v26 = vpop.permute.xlu1 %517  ;;  %v720_v9 = vmul.f32 %v1518_v37, %v656_v62  ;;  %v598_v37 = vmul.f32 -0.13333334, %v1535_v3 }
 0x205   : > { %v743_v63 = vmul.f32 %v1573_v18, %v677_v56  ;;  %v998_v5 = vpop.eup %997  ;;  %v547_v28 = vadd.f32 %v520_v60, %v367_v0  ;;  %v546_v27 = vadd.f32 %v518_v26, %v366_v10  ;;  %v679_v3 = vadd.f32 %v671_v20, %v599_v7  ;;  %v590_v26 = vld [vmem:[#allocation4 + $0x48] sm:$0xff] }
 0x206   : > { %v753_v6 = vadd.f32 %v1522_v41, %v742_v59  ;;  %v1000_v14 = vpop.eup %999  ;;  %v702_v29 = vmul.f32 %v998_v5, %v686_v42  ;;  %v721_v1 = vmul.f32 %v1524_v19, %v657_v23  ;;  %v730_v2 = vadd.f32 %v1578_v55, %v720_v9 }
 0x207   : > { %v754_v16 = vadd.f32 %v1527_v45, %v743_v63  ;;  %v703_v4 = vmul.f32 %v1000_v14, %v687_v43  ;;  %v678_v35 = vadd.f32 %v670_v17, %v598_v37  ;;  %572 = vst.msk [vmem:[#allocation4 + $0x40] sm:$0x3] %vm553_vm7, %v547_v28 }
 0x208   : > { %890 = vst.msk [vmem:[%s1539_s8 + $0x50] sm:$0xff] %vm229_vm0, %v753_v6  ;;  %v710_v15 = vsub.f32 2.0, %v702_v29  ;;  %v731_v12 = vadd.f32 %v1583_v8, %v721_v1 }
 0x209   : > { %891 = vst.msk [vmem:[%s1539_s8 + $0x58] sm:$0xff] %vm229_vm0, %v754_v16  ;;  %v711_v33 = vsub.f32 2.0, %v703_v4  ;;  %v587_v19 = vld [vmem:[#allocation4 + $0x20] sm:$0xff] }
 0x20a   : > { %757 = vst.msk [vmem:[%s1539_s8] sm:$0xff] %vm229_vm0, %v730_v2  ;;  %v618_v34 = vld [vmem:[#allocation4 + $0x19] sm:$0xff]  ;;  %v619_v13 = vld [vmem:[#allocation4 + $0x21] sm:$0xff]  ;;  %v718_v36 = vmul.f32 %v998_v5, %v710_v15 }
 0x20b   : > { %758 = vst.msk [vmem:[%s1539_s8 + $0x8] sm:$0xff] %vm229_vm0, %v731_v12  ;;  %v626_v24 = vadd.f32 %v618_v34, %v586_v30  ;;  %v627_v40 = vadd.f32 %v619_v13, %v587_v19  ;;  %v719_v42 = vmul.f32 %v1000_v14, %v711_v33  ;;  %v650_v43 = vld [vmem:[#allocation4 + $0x1a] sm:$0xff]  ;;  %v651_v44 = vld [vmem:[#allocation4 + $0x22] sm:$0xff] }
 0x20c   : > { %v744_v46 = vmul.f32 %v718_v36, %v678_v35  ;;  %571 = vst.msk [vmem:[#allocation4 + $0x38] sm:$0xff] %vm229_vm0, %v546_v27  ;;  %v526_v21 = vpop.permute.xlu0 %525  ;;  %v524_v49 = vpop.permute.xlu1 %523 }
 0x20d   : > { %v658_v47 = vadd.f32 %v650_v43, %v626_v24  ;;  %v659_v48 = vadd.f32 %v651_v44, %v627_v40  ;;  %v745_v38 = vmul.f32 %v719_v42, %v679_v3  ;;  %v550_v39 = vadd.f32 %v526_v21, %v370_v25 }
 0x20e   : > { %v755_v50 = vadd.f32 %v1522_v41, %v744_v46  ;;  %v549_v58 = vadd.f32 %v524_v49, %v369_v31  ;;  %v588_v41 = vld [vmem:[#allocation4 + $0x30] sm:$0xff] }
 0x20f   : > { %v722_v22 = vmul.f32 %v1547_v53, %v658_v47  ;;  %v723_v54 = vmul.f32 %v1552_v11, %v659_v48  ;;  %v756_v52 = vadd.f32 %v1527_v45, %v745_v38  ;;  %575 = vst.msk [vmem:[#allocation4 + $0x58] sm:$0x3] %vm553_vm7, %v550_v39 }
 0x210   : > { %892 = vst.msk [vmem:[%s1539_s8 + $0x70] sm:$0xff] %vm229_vm0, %v755_v50 }
 0x211   : > { %v732_v56 = vadd.f32 %v1578_v55, %v722_v22  ;;  %v733_v57 = vadd.f32 %v1583_v8, %v723_v54  ;;  %893 = vst.msk [vmem:[%s1539_s8 + $0x78] sm:$0xff] %vm229_vm0, %v756_v52 }
 0x212   : > { %574 = vst.msk [vmem:[#allocation4 + $0x50] sm:$0xff] %vm229_vm0, %v549_v58 }
 0x213   : > { %759 = vst.msk [vmem:[%s1539_s8 + $0x20] sm:$0xff] %vm229_vm0, %v732_v56  ;;  %v589_v32 = vld [vmem:[#allocation4 + $0x38] sm:$0xff] }
 0x214   : > { %760 = vst.msk [vmem:[%s1539_s8 + $0x28] sm:$0xff] %vm229_vm0, %v733_v57  ;;  %v620_v53 = vld [vmem:[#allocation4 + $0x31] sm:$0xff]  ;;  %v621_v45 = vld [vmem:[#allocation4 + $0x39] sm:$0xff] }
 0x215   : > { %v628_v11 = vadd.f32 %v620_v53, %v588_v41  ;;  %v629_v59 = vadd.f32 %v621_v45, %v589_v32  ;;  %v652_v61 = vld [vmem:[#allocation4 + $0x32] sm:$0xff]  ;;  %v653_v62 = vld [vmem:[#allocation4 + $0x3a] sm:$0xff] }
 0x217   : > { %v660_v63 = vadd.f32 %v652_v61, %v628_v11  ;;  %v661_v23 = vadd.f32 %v653_v62, %v629_v59 }
 0x219   : > { %v724_v0 = vmul.f32 %v1570_v51, %v660_v63  ;;  %v725_v60 = vmul.f32 %v1573_v18, %v661_v23  ;;  %v591_v7 = vld [vmem:[#allocation4 + $0x50] sm:$0xff] }
 0x21a   : > { %v622_v9 = vld [vmem:[#allocation4 + $0x49] sm:$0xff]  ;;  %v623_v10 = vld [vmem:[#allocation4 + $0x51] sm:$0xff] }
 0x21b   : > { %v734_v5 = vadd.f32 %v1578_v55, %v724_v0  ;;  %v735_v6 = vadd.f32 %v1583_v8, %v725_v60  ;;  %v630_v14 = vadd.f32 %v622_v9, %v590_v26  ;;  %v631_v16 = vadd.f32 %v623_v10, %v591_v7  ;;  %v654_v51 = vld [vmem:[#allocation4 + $0x4a] sm:$0xff]  ;;  %v655_v18 = vld [vmem:[#allocation4 + $0x52] sm:$0xff] }
 0x21d   : > { %761 = vst.msk [vmem:[%s1539_s8 + $0x40] sm:$0xff] %vm229_vm0, %v734_v5  ;;  %v662_v17 = vadd.f32 %v654_v51, %v630_v14  ;;  %v663_v29 = vadd.f32 %v655_v18, %v631_v16 }
 0x21e   : > { %762 = vst.msk [vmem:[%s1539_s8 + $0x48] sm:$0xff] %vm229_vm0, %v735_v6 }
 0x21f   : > { %v726_v1 = vmul.f32 %v718_v36, %v662_v17  ;;  %v727_v20 = vmul.f32 %v719_v42, %v663_v29 }
 0x221   : > { %v736_v4 = vadd.f32 %v1578_v55, %v726_v1  ;;  %v737_v2 = vadd.f32 %v1583_v8, %v727_v20 }
 0x223   : > { %763 = vst.msk [vmem:[%s1539_s8 + $0x60] sm:$0xff] %vm229_vm0, %v736_v4 }
 0x224   : > { %764 = vst.msk [vmem:[%s1539_s8 + $0x68] sm:$0xff] %vm229_vm0, %v737_v2 }
 0x225   : > { %1088 = shalt.err (!%p1085_p10)
}
 0x226   : > { %s1140_s30 = smov 128   ;;  %s1141_s15 = smov 8  }
 0x227   : > { %910 = dma.vmem_to_hbm [thread:$0]  (%p1226_p3), %s789_s13, 2048, %s791_s22, %s775_s26, %s1140_s30, %s1140_s30, %s1141_s15  }
 0x228 PF: > { %s805_s20 = sand.u32 1, %s1119_s9   ;;  %p1677_p12 = scmp.ge.s32.totalorder %s1131_s12, 2 }
 0x229   : > { %s806_s24 = scalar_lea.sflag [#allocation7], %s805_s20 }
 0x22a   : > { %p921_p13 = pnand %p1677_p12, %p1192_p6 }
 0x22c   : > { %p922_p0 = pneg %p921_p13 }
 0x22e   : > { %1114 = dma.done.wait (%p922_p0), %s806_s24, 2048  }
 0x22f   : > { %1116 = vsyncadd (%p922_p0), %s806_s24, 4294965248  ;;  %p16_p5 = scmp.ge.s32.totalorder %s1210_s23, 4   ;;  %s1678_s9 = smov %s1123_s10 }
 0x230   : > { %s1679_s10 = smov %s1127_s11  ;;  %s1680_s11 = smov %s1222_s28 }
 0x231   : > { %s1681_s12 = smov %s1210_s23  ;;  %18 = sbr.rel (!%p16_p5) target bundleno = 6 (0x6), region = 79 }
 0x236   :  { %812 = vsyncpa [#allocation6], 1 }
 0x237   :  { %814 = vsyncpa [#allocation6 + $0x1], 1 }
 0x238   :  { %815 = vsyncpa [#allocation9], 1 }
 0x239   :  { %816 = vsyncpa [#allocation7], 1 }
 0x23a   :  { %818 = vsyncpa [#allocation7 + $0x1], 1 }

</bundles_post_ra>
